<compile_context>
chip_gen: v6e
topology: v6e:2x2x1
jax: 0.10.0
libtpu: 0.0.40
codegen_flags: <defaults>
</compile_context>

<pallas_src>
import jax
import jax.numpy as jnp
from jax.experimental import pallas as pl
from jax.experimental.pallas import tpu as pltpu


def _attention_pooling_kernel(x_ref, wt_ref, o_ref):
    # x_ref:  (TB, S, D) batch tile of the input (native dtype)
    # wt_ref: (D, D)     transposed Linear weight W^T, resident across the grid
    # o_ref:  (TB, D)    pooled output tile
    TB, S, D = x_ref.shape
    x = x_ref[...]

    # attention_scores = x @ W^T on the MXU in wt's dtype (bf16 by default), f32 accumulation.
    # Bias is omitted: softmax over S is shift-invariant per feature column.
    # NOTE: the (TB,S,D)<->(TB*S,D) reshapes are free views when S % 8 == 0 (f32 sublane pack).
    scores = jnp.dot(
        x.reshape(TB * S, D).astype(wt_ref.dtype),
        wt_ref[...],
        preferred_element_type=jnp.float32,
    ).reshape(TB, S, D)

    # TODO(synk): optional boolean `mask` path of the module (scores[mask] = -inf) is not
    # implemented; only the plain-tensor forward is reproduced here.
    # TODO(synk): for very long S, add an "arbitrary" S grid axis with online-softmax
    # m/l/acc scratch instead of materializing full (TB,S,D) f32 intermediates.
    # TODO(synk): on v6e/v7x an EUP-bound configuration can run the exp / e*x product in
    # bf16 (f32 kept here so the same code is exact-ish and v5e-safe).

    # softmax over the sequence dim (torch dim=1), fused with the pooling reduction.
    m = jnp.max(scores, axis=1, keepdims=True)      # (TB, 1, D)
    e = jnp.exp(scores - m)                         # (TB, S, D) f32, EUP
    denom = jnp.sum(e, axis=1)                      # (TB, D)    f32
    num = jnp.sum(e * x, axis=1)                    # (TB, D)    promotes to f32

    inv = pl.reciprocal(denom, approx=True)         # EUP reciprocal (separate slot, ~free)
    o_ref[...] = (num * inv).astype(o_ref.dtype)


def _vmem_capacity_bytes():
    try:
        info = pltpu.get_tpu_info()
        cap = getattr(info, "vmem_capacity_bytes", None)
        if cap:
            return int(cap)
    except Exception:
        pass
    return 64 << 20  # conservative default (v7x per-TensorCore VMEM)


def _auto_batch_tile(B, S, D, x_it, o_it, w_it, budget_bytes, wt_bytes):
    """Pick TB so the MXU M dim (TB*S) is well fed, under the per-step VMEM budget."""
    # Per-batch-row VMEM bytes per grid step: double-buffered x tile, bf16 matmul copy of x,
    # f32 scores + exp intermediates, output tile + small f32 row temporaries.
    per_row = S * D * (2 * x_it + w_it + 2 * 4) + D * (2 * o_it + 4 * 4)
    tb_cap = max(1, (budget_bytes - 2 * wt_bytes) // per_row)

    target_m = 512                                   # >=256 fills a 256x256 MXU; 512 helps v5e
    tb = max(-(-target_m // S), 1)
    tb = max(1, min(tb, tb_cap))
    if tb >= B:
        return B                                     # single step, full-batch block
    return max(8, (tb // 8) * 8)                     # (TB, D) out block needs sublane-aligned TB


def attention_pooling(x, weight, bias=None, *, matmul_dtype=jnp.bfloat16, batch_tile=None):
    """
    x:      (B, S, D)
    weight: (D, D) torch nn.Linear weight, i.e. scores = x @ weight.T + bias
    bias:   (D,)   accepted for API parity; mathematically a no-op for this module's output
                   (softmax over the sequence axis cancels a per-feature constant shift).
    returns (B, D)
    """
    del bias  # exact no-op for the output; dropping it saves a DMA stream and VPU adds.

    B, S, D = x.shape
    out_dtype = x.dtype
    wt = weight.T.astype(matmul_dtype)               # (D, D) W^T, tiny one-time wrapper cast

    x_it = jnp.dtype(x.dtype).itemsize
    o_it = jnp.dtype(out_dtype).itemsize
    w_it = jnp.dtype(matmul_dtype).itemsize
    wt_bytes = D * D * w_it

    vmem_cap = _vmem_capacity_bytes()
    budget = int(vmem_cap * 0.7)                     # headroom for compiler scratch

    if batch_tile is None:
        TB = _auto_batch_tile(B, S, D, x_it, o_it, w_it, budget, wt_bytes)
    else:
        TB = min(int(batch_tile), B)
        if TB < B:
            TB = max(8, (TB // 8) * 8)

    # TODO(synk): for very large D (>= ~1536-2048 f32 on v7x), add an output-feature grid
    # axis tiling W^T columns (exact, since the softmax is per column) instead of one block.
    steps = pl.cdiv(B, TB)                           # ragged B -> masked edge block, no pad
    grid = (steps,)

    # Per-step VMEM footprint -> explicit scoped-VMEM limit (defaults are 16/32 MiB only).
    per_step = (
        2 * TB * S * D * x_it                        # double-buffered x tile
        + TB * S * D * w_it                          # bf16 copy of x for the MXU
        + 2 * TB * S * D * 4                         # f32 scores + exp intermediates
        + 2 * TB * D * o_it                          # double-buffered output tile
        + 4 * TB * D * 4                             # f32 num/denom/inv/m row temporaries
        + 2 * wt_bytes                               # W^T (<= 2 buffers)
    )
    vmem_limit = int(min(int(vmem_cap * 0.85), max(per_step + (8 << 20), 32 << 20)))

    cost = pl.CostEstimate(
        flops=int(2 * B * S * D * D + 4 * B * S * D),
        transcendentals=int(B * S * D),
        bytes_accessed=int(B * S * D * x_it + D * D * w_it + B * D * o_it),
    )

    x_spec = pl.BlockSpec((TB, S, D), lambda i: (i, 0, 0))     # full-S/full-D block (no pad)
    out_spec = pl.BlockSpec((TB, D), lambda i: (i, 0))

    def _run(wt_spec):
        return pl.pallas_call(
            _attention_pooling_kernel,
            out_shape=jax.ShapeDtypeStruct((B, D), out_dtype),
            grid_spec=pltpu.PrefetchScalarGridSpec(
                num_scalar_prefetch=0,
                grid=grid,
                in_specs=[x_spec, wt_spec],
                out_specs=out_spec,
            ),
            compiler_params=pltpu.CompilerParams(
                dimension_semantics=("parallel",),             # batch axis -> megacore/2-TC
                vmem_limit_bytes=vmem_limit,
            ),
            cost_estimate=cost,
        )(x, wt)

    try:
        # Resident weight: single buffer (its block index never changes), halving its VMEM cost.
        wt_spec = pl.BlockSpec((D, D), lambda i: (0, 0), pipeline_mode=pl.Buffered(1))
        return _run(wt_spec)
    except Exception:
        # Fallback for jax versions without pipeline_mode / Buffered(1) support.
        return _run(pl.BlockSpec((D, D), lambda i: (0, 0)))


def _reference(x, weight, bias):
    scores = jnp.einsum("bsd,od->bso", x, weight) + bias
    attn = jax.nn.softmax(scores, axis=1)
    return jnp.sum(attn * x, axis=1)


if __name__ == "__main__":
    B, S, D = 2, 8, 32
    key = jax.random.PRNGKey(0)
    kx, kw, kb = jax.random.split(key, 3)

    x = jax.random.normal(kx, (B, S, D), dtype=jnp.float32)
    bound = 1.0 / (D ** 0.5)
    weight = jax.random.uniform(kw, (D, D), minval=-bound, maxval=bound, dtype=jnp.float32)
    bias = jax.random.uniform(kb, (D,), minval=-bound, maxval=bound, dtype=jnp.float32)

    ref = _reference(x, weight, bias)

    # Default path: bf16 MXU operands, f32 accumulation (tolerance covers the bf16 rounding
    # of the score matmul operands plus the approximate EUP reciprocal).
    out = jax.block_until_ready(attention_pooling(x, weight, bias))
    assert out.shape == (B, D)
    assert jnp.allclose(out, ref, atol=5e-2, rtol=5e-2), float(jnp.max(jnp.abs(out - ref)))

    # Exact-precision path (f32 matmul operands); tolerance covers only the approx reciprocal.
    out_f32 = jax.block_until_ready(attention_pooling(x, weight, bias, matmul_dtype=jnp.float32))
    assert jnp.allclose(out_f32, ref, atol=2e-3, rtol=2e-3), float(jnp.max(jnp.abs(out_f32 - ref)))

    # Larger case exercising the batch-tiled grid with a ragged (masked) edge block.
    B2, S2, D2 = 20, 16, 128
    x2 = jax.random.normal(kx, (B2, S2, D2), dtype=jnp.float32)
    bound2 = 1.0 / (D2 ** 0.5)
    w2 = jax.random.uniform(kw, (D2, D2), minval=-bound2, maxval=bound2, dtype=jnp.float32)
    b2 = jax.random.uniform(kb, (D2,), minval=-bound2, maxval=bound2, dtype=jnp.float32)
    out2 = jax.block_until_ready(attention_pooling(x2, w2, b2))
    ref2 = _reference(x2, w2, b2)
    assert out2.shape == (B2, D2)
    assert jnp.allclose(out2, ref2, atol=5e-2, rtol=5e-2), float(jnp.max(jnp.abs(out2 - ref2)))

    print("KERNEL_OK")
</pallas_src>

<mosaic_0001>
module attributes {stable_mosaic.version = 11 : i64} {
  func.func @_attention_pooling_kernel(%arg0: i32, %arg1: memref<2x8x32xf32, #tpu.memory_space<vmem>>, %arg2: memref<32x32xbf16, #tpu.memory_space<vmem>>, %arg3: memref<2x32xf32, #tpu.memory_space<vmem>>) attributes {dimension_semantics = [#tpu.dimension_semantics<parallel>], iteration_bounds = array<i64: 1>, scalar_prefetch = 0 : i64, scratch_operands = 0 : i64, tpu.core_type = #tpu.core_type<tc>, window_params = [{transform_indices = @transform_0, window_bounds = array<i64: 2, 8, 32>}, {pipeline_mode = #tpu.pipeline_mode<synchronous>, transform_indices = @transform_1, window_bounds = array<i64: 32, 32>}, {transform_indices = @transform_2, window_bounds = array<i64: 2, 32>}]} {
    %c0 = arith.constant 0 : index
    %c0_0 = arith.constant 0 : index
    %c0_1 = arith.constant 0 : index
    %0 = vector.load %arg1[%c0, %c0_0, %c0_1] : memref<2x8x32xf32, #tpu.memory_space<vmem>>, vector<2x8x32xf32>
    %1 = vector.shape_cast %0 : vector<2x8x32xf32> to vector<16x32xf32>
    %2 = arith.truncf %1 : vector<16x32xf32> to vector<16x32xbf16>
    %c0_2 = arith.constant 0 : index
    %c0_3 = arith.constant 0 : index
    %3 = vector.load %arg2[%c0_2, %c0_3] : memref<32x32xbf16, #tpu.memory_space<vmem>>, vector<32x32xbf16>
    %cst = arith.constant dense<0.000000e+00> : vector<16x32xf32>
    %4 = tpu.matmul %2, %3, %cst {dimension_numbers = #tpu.dot_dimension_numbers<[1], [0], [0], [1], [0, 0, 1, 1], [], []>} : vector<16x32xbf16>, vector<32x32xbf16>, vector<16x32xf32> -> vector<16x32xf32>
    %5 = vector.shape_cast %4 : vector<16x32xf32> to vector<2x8x32xf32>
    %cst_4 = arith.constant dense<0xFF800000> : vector<2x32xf32>
    %6 = vector.multi_reduction <maximumf>, %5, %cst_4 [1] : vector<2x8x32xf32> to vector<2x32xf32>
    %7 = vector.shape_cast %6 : vector<2x32xf32> to vector<2x1x32xf32>
    %8 = vector.broadcast %7 : vector<2x1x32xf32> to vector<2x8x32xf32>
    %9 = arith.subf %5, %8 : vector<2x8x32xf32>
    %10 = math.exp %9 : vector<2x8x32xf32>
    %cst_5 = arith.constant dense<0.000000e+00> : vector<2x32xf32>
    %11 = vector.multi_reduction <add>, %10, %cst_5 [1] : vector<2x8x32xf32> to vector<2x32xf32>
    %12 = arith.mulf %10, %0 : vector<2x8x32xf32>
    %cst_6 = arith.constant dense<0.000000e+00> : vector<2x32xf32>
    %13 = vector.multi_reduction <add>, %12, %cst_6 [1] : vector<2x8x32xf32> to vector<2x32xf32>
    %14 = tpu.reciprocal %11 {approx = true} : vector<2x32xf32> -> vector<2x32xf32>
    %15 = arith.mulf %13, %14 : vector<2x32xf32>
    %c0_7 = arith.constant 0 : index
    %c0_8 = arith.constant 0 : index
    %16 = vector.load %arg3[%c0_7, %c0_8] : memref<2x32xf32, #tpu.memory_space<vmem>>, vector<2x32xf32>
    tpu.vector_store %arg3[%c0_7, %c0_8], %15 {strides = array<i32>} : memref<2x32xf32, #tpu.memory_space<vmem>>, vector<2x32xf32>,
    return
  }
  func.func @transform_0(%arg0: i32) -> (i32, i32, i32) {
    %c0_i32 = arith.constant 0 : i32
    %c0_i32_0 = arith.constant 0 : i32
    %c0_i32_1 = arith.constant 0 : i32
    return %arg0, %c0_i32, %c0_i32_0 : i32, i32, i32
  }
  func.func @transform_1(%arg0: i32) -> (i32, i32) {
    %c0_i32 = arith.constant 0 : i32
    %c0_i32_0 = arith.constant 0 : i32
    %c0_i32_1 = arith.constant 0 : i32
    return %c0_i32, %c0_i32_0 : i32, i32
  }
  func.func @transform_2(%arg0: i32) -> (i32, i32) {
    %c0_i32 = arith.constant 0 : i32
    %c0_i32_0 = arith.constant 0 : i32
    return %arg0, %c0_i32 : i32, i32
  }
}

module attributes {stable_mosaic.version = 11 : i64} {
  func.func @_attention_pooling_kernel(%arg0: i32, %arg1: memref<2x8x32xf32, #tpu.memory_space<vmem>>, %arg2: memref<32x32xbf16, #tpu.memory_space<vmem>>, %arg3: memref<2x32xf32, #tpu.memory_space<vmem>>) attributes {dimension_semantics = [#tpu.dimension_semantics<parallel>], iteration_bounds = array<i64: 1>, scalar_prefetch = 0 : i64, scratch_operands = 0 : i64, tpu.core_type = #tpu.core_type<tc>, window_params = [{transform_indices = @transform_0, window_bounds = array<i64: 2, 8, 32>}, {pipeline_mode = #tpu.pipeline_mode<synchronous>, transform_indices = @transform_1, window_bounds = array<i64: 32, 32>}, {transform_indices = @transform_2, window_bounds = array<i64: 2, 32>}]} {
    %c0 = arith.constant 0 : index
    %c0_0 = arith.constant 0 : index
    %c0_1 = arith.constant 0 : index
    %0 = vector.load %arg1[%c0, %c0_0, %c0_1] : memref<2x8x32xf32, #tpu.memory_space<vmem>>, vector<2x8x32xf32>
    %1 = vector.shape_cast %0 : vector<2x8x32xf32> to vector<16x32xf32>
    %2 = arith.truncf %1 : vector<16x32xf32> to vector<16x32xbf16>
    %c0_2 = arith.constant 0 : index
    %c0_3 = arith.constant 0 : index
    %3 = vector.load %arg2[%c0_2, %c0_3] : memref<32x32xbf16, #tpu.memory_space<vmem>>, vector<32x32xbf16>
    %cst = arith.constant dense<0.000000e+00> : vector<16x32xf32>
    %4 = tpu.matmul %2, %3, %cst {dimension_numbers = #tpu.dot_dimension_numbers<[1], [0], [0], [1], [0, 0, 1, 1], [], []>} : vector<16x32xbf16>, vector<32x32xbf16>, vector<16x32xf32> -> vector<16x32xf32>
    %5 = vector.shape_cast %4 : vector<16x32xf32> to vector<2x8x32xf32>
    %cst_4 = arith.constant dense<0xFF800000> : vector<2x32xf32>
    %6 = vector.multi_reduction <maximumf>, %5, %cst_4 [1] : vector<2x8x32xf32> to vector<2x32xf32>
    %7 = vector.shape_cast %6 : vector<2x32xf32> to vector<2x1x32xf32>
    %8 = vector.broadcast %7 : vector<2x1x32xf32> to vector<2x8x32xf32>
    %9 = arith.subf %5, %8 : vector<2x8x32xf32>
    %10 = math.exp %9 : vector<2x8x32xf32>
    %cst_5 = arith.constant dense<0.000000e+00> : vector<2x32xf32>
    %11 = vector.multi_reduction <add>, %10, %cst_5 [1] : vector<2x8x32xf32> to vector<2x32xf32>
    %12 = arith.mulf %10, %0 : vector<2x8x32xf32>
    %cst_6 = arith.constant dense<0.000000e+00> : vector<2x32xf32>
    %13 = vector.multi_reduction <add>, %12, %cst_6 [1] : vector<2x8x32xf32> to vector<2x32xf32>
    %14 = tpu.reciprocal %11 {approx = true} : vector<2x32xf32> -> vector<2x32xf32>
    %15 = arith.mulf %13, %14 : vector<2x32xf32>
    %c0_7 = arith.constant 0 : index
    %c0_8 = arith.constant 0 : index
    %16 = vector.load %arg3[%c0_7, %c0_8] : memref<2x32xf32, #tpu.memory_space<vmem>>, vector<2x32xf32>
    tpu.vector_store %arg3[%c0_7, %c0_8], %15 {strides = array<i32>} : memref<2x32xf32, #tpu.memory_space<vmem>>, vector<2x32xf32>,
    return
  }
  func.func @transform_0(%arg0: i32) -> (i32, i32, i32) {
    %c0_i32 = arith.constant 0 : i32
    %c0_i32_0 = arith.constant 0 : i32
    %c0_i32_1 = arith.constant 0 : i32
    return %arg0, %c0_i32, %c0_i32_0 : i32, i32, i32
  }
  func.func @transform_1(%arg0: i32) -> (i32, i32) {
    %c0_i32 = arith.constant 0 : i32
    %c0_i32_0 = arith.constant 0 : i32
    %c0_i32_1 = arith.constant 0 : i32
    return %c0_i32, %c0_i32_0 : i32, i32
  }
  func.func @transform_2(%arg0: i32) -> (i32, i32) {
    %c0_i32 = arith.constant 0 : i32
    %c0_i32_0 = arith.constant 0 : i32
    return %arg0, %c0_i32 : i32, i32
  }
}

</mosaic_0001>

<bundles_post_ra>
// kernel: tpu_custom_call.1
= control target key start
LH: loop header
LB: loop body
LE: loop exit
PB: predicated region body
PF: predicated region fallthrough
CT: control target
= control target key end

     0   :  { %7 = vsyncpa [#allocation3], 0  ;;  %s321_s0 = inlined_call_operand.hbm [shape: f32[2,8,32], index: 0, kind: input, shape index: {}]   ;;  %s322_s1 = inlined_call_operand.hbm [shape: bf16[32,32], index: 1, kind: input, shape index: {}]   ;;  %s323_s2 = inlined_call_operand.hbm [shape: f32[2,32], index: 2, kind: output, shape index: {}]  }
   0x1   :  { %8 = vsyncpa [#allocation6], 0 }
   0x2   :  { %9 = vsyncpa [#allocation4], 0  ;;  %s281_s9 = smov [#allocation2]  }
   0x3   :  { %s15_s10 = sshll.u32 %s281_s9, 4  ;;  %s16_s10 = int_to_ptr.vmem [resolvable:$true] %s15_s10 }
   0x4   :  { %s223_s11 = scalar_lea.vmem %s16_s10, 256  ;;  %p228_p1 = scmp.lt.s32.totalorder %s16_s10, %s16_s10 }
   0x5   :  { %p224_p0 = scmp.ne.s32.totalorder %s16_s10, %s223_s11  ;;  %p229_p2 = scmp.lt.s32.totalorder %s223_s11, %s223_s11 }
   0x7   :  { %p230_p3 = por %p229_p2, %p228_p1 }
   0x9   :  { %p231_p4 = pnand %p230_p3, %p224_p0 }
   0xb   :  { %234 = shalt.err (!%p231_p4)
}
   0xc   :  { %s282_s12 = smov 128   ;;  %s283_s13 = smov 8  }
   0xd   :  { %21 = dma.hbm_to_vmem [thread:$0]  %s321_s0, 256, %s16_s10, [#allocation3], %s282_s12, %s282_s12, %s283_s13  }
   0xe   :  { %s284_s16 = smov [#allocation5]  }
   0xf   :  { %s27_s17 = sshll.u32 %s284_s16, 4  ;;  %s28_s17 = int_to_ptr.vmem [resolvable:$true] %s27_s17 }
  0x10   :  { %s243_s18 = scalar_lea.vmem %s28_s17, 256  ;;  %p248_p6 = scmp.lt.s32.totalorder %s28_s17, %s28_s17 }
  0x11   :  { %p244_p5 = scmp.ne.s32.totalorder %s28_s17, %s243_s18  ;;  %p249_p7 = scmp.lt.s32.totalorder %s243_s18, %s243_s18 }
  0x13   :  { %p250_p8 = por %p249_p7, %p248_p6 }
  0x15   :  { %p251_p9 = pnand %p250_p8, %p244_p5 }
  0x17   :  { %254 = shalt.err (!%p251_p9)
}
  0x18   :  { %s285_s19 = smov 64   ;;  %s286_s20 = smov 4  }
  0x19   :  { %33 = dma.hbm_to_vmem [thread:$0]  %s322_s1, 256, %s28_s17, [#allocation6], %s285_s19, %s285_s19, %s286_s20  }
  0x1a   :  { %275 = dma.done.wait [#allocation3], 256  }
  0x1b   :  { %276 = vsyncadd [#allocation3], 4294967040 }
  0x1c   :  { %277 = dma.done.wait [#allocation6], 256  }
  0x1d   :  { %278 = vsyncadd [#allocation6], 4294967040  ;;  %v287_v0 = vmov 0.0   ;;  %vm288_vm0 = vmmov 0   ;;  %v205_v1 = vld [vmem:[#allocation5 + $0x8] sm:$0xff]   ;;  %v206_v2 = vld [vmem:[#allocation5] sm:$0xff]  }
  0x1e   :  { %188 = vmatprep.subr.bf16.mxu0 %v287_v0  ;;  %192 = vmatprep.mubr.msk.bf16.mxu0 %vm288_vm0, %v287_v0  ;;  %v41_v3 = vld [vmem:[#allocation2] sm:$0xff]  ;;  %v42_v4 = vld [vmem:[#allocation2 + $0x8] sm:$0xff]  ;;  %vm60_vm1 = vcmask 261120   ;;  %s289_s0 = smov [#allocation7]   ;;  %vm161_vm2 = vcmask 1041409   ;;  %vm164_vm3 = vcmask 254976  }
  0x1f   :  { %189 = vmatpush3.bf16.msra.mxu0 %v205_v1  ;;  %v43_v5 = vpack.c.bf16 %v42_v4, %v41_v3  ;;  %s172_s1 = sshll.u32 %s289_s0, 4  ;;  %s173_s1 = int_to_ptr.vmem [resolvable:$true] %s172_s1 }
  0x20   :  { %190 = vmatprep.subr.bf16.mxu0 %v287_v0  ;;  %s255_s23 = scalar_lea.vmem %s173_s1, 32  ;;  %p260_p11 = scmp.lt.s32.totalorder %s173_s1, %s173_s1 }
  0x21   :  { %p256_p10 = scmp.ne.s32.totalorder %s173_s1, %s255_s23  ;;  %p261_p12 = scmp.lt.s32.totalorder %s255_s23, %s255_s23 }
  0x23   :  { %191 = vmatpush3.bf16.msra.mxu0 %v206_v2  ;;  %p262_p13 = por %p261_p12, %p260_p11 }
  0x25   :  { %p263_p0 = pnand %p262_p13, %p256_p10 }
  0x26   :  { %193 = vmatmul.mubr.msk.bf16.vlgmr.msra.gmra.mxu0 %vm60_vm1, %v43_v5 }
  0xe6   :  { %v98_v6 = vpop.f32.mrf.mxu0 }
  0xe7   :  { %v105_v7 = vsel %vm60_vm1, %v98_v6, -inf }
  0xe8   :  { %v106_v8 = vrot.slane %v105_v7, 4  ;;  %v194_v9 = vpop.f32.mrf.mxu0 }
  0xea   :  { %v107_v10 = vmax.f32 %v105_v7, %v106_v8  ;;  %v101_v11 = vpop.f32.mrf.mxu0 }
  0xeb   :  { %v112_v12 = vsel %vm60_vm1, %v101_v11, -inf }
  0xec   :  { %v108_v13 = vrot.slane %v107_v10, 2  ;;  %v113_v14 = vrot.slane %v112_v12, 4  ;;  %v195_v15 = vpop.f32.mrf.mxu0 }
  0xee   :  { %v109_v16 = vmax.f32 %v107_v10, %v108_v13  ;;  %v114_v17 = vmax.f32 %v112_v12, %v113_v14 }
  0xf0   :  { %v110_v18 = vrot.slane %v109_v16, 1  ;;  %v115_v19 = vrot.slane %v114_v17, 2 }
  0xf2   :  { %v111_v20 = vmax.f32 %v109_v16, %v110_v18  ;;  %v116_v21 = vmax.f32 %v114_v17, %v115_v19 }
  0xf4   :  { %v119_v22 = vsub.f32 %v98_v6, %v111_v20  ;;  %v117_v23 = vrot.slane %v116_v21, 1 }
  0xf6   :  { %v121_v24 = vmul.f32 1.442695, %v119_v22  ;;  %v118_v25 = vmax.f32 %v116_v21, %v117_v23 }
  0xf8   :  { %207 = vpow2.f32 %v121_v24  ;;  %v120_v26 = vsub.f32 %v101_v11, %v118_v25 }
  0xfa   :  { %v123_v27 = vmul.f32 1.442695, %v120_v26 }
  0xfc   :  { %209 = vpow2.f32 %v123_v27 }
 0x105   :  { %v208_v28 = vpop.eup %207 }
 0x106   :  { %v125_v29 = vsel %vm60_vm1, %v208_v28, 0.0  ;;  %v139_v31 = vmul.f32 %v208_v28, %v41_v3 }
 0x107   :  { %v126_v30 = vrot.slane %v125_v29, 4 }
 0x108   :  { %v141_v38 = vsel %vm60_vm1, %v139_v31, 0.0 }
 0x109   :  { %v210_v32 = vpop.eup %209  ;;  %v127_v33 = vadd.f32 %v126_v30, %v125_v29  ;;  %v142_v44 = vrot.slane %v141_v38, 4 }
 0x10a   :  { %v132_v34 = vsel %vm60_vm1, %v210_v32, 0.0  ;;  %v140_v35 = vmul.f32 %v210_v32, %v42_v4 }
 0x10b   :  { %v128_v36 = vrot.slane %v127_v33, 2  ;;  %v133_v37 = vrot.slane %v132_v34, 4  ;;  %v143_v49 = vadd.f32 %v142_v44, %v141_v38 }
 0x10c   :  { %v148_v39 = vsel %vm60_vm1, %v140_v35, 0.0 }
 0x10d   :  { %v129_v40 = vadd.f32 %v128_v36, %v127_v33  ;;  %v134_v41 = vadd.f32 %v133_v37, %v132_v34  ;;  %v149_v45 = vrot.slane %v148_v39, 4  ;;  %v144_v52 = vrot.slane %v143_v49, 2 }
 0x10f   :  { %v130_v42 = vrot.slane %v129_v40, 1  ;;  %v135_v43 = vrot.slane %v134_v41, 2  ;;  %v150_v50 = vadd.f32 %v149_v45, %v148_v39  ;;  %v145_v54 = vadd.f32 %v144_v52, %v143_v49 }
 0x111   :  { %v131_v46 = vadd.f32 %v130_v42, %v129_v40  ;;  %v136_v47 = vadd.f32 %v135_v43, %v134_v41  ;;  %v151_v53 = vrot.slane %v150_v50, 2  ;;  %v146_v56 = vrot.slane %v145_v54, 1 }
 0x113   :  { %v137_v48 = vrot.slane %v136_v47, 1  ;;  %211 = vrcp.f32 %v131_v46  ;;  %v152_v55 = vadd.f32 %v151_v53, %v150_v50  ;;  %v147_v59 = vadd.f32 %v146_v56, %v145_v54 }
 0x115   :  { %v138_v51 = vadd.f32 %v137_v48, %v136_v47  ;;  %v153_v57 = vrot.slane %v152_v55, 1 }
 0x117   :  { %213 = vrcp.f32 %v138_v51  ;;  %v154_v60 = vadd.f32 %v153_v57, %v152_v55 }
 0x120   :  { %v212_v58 = vpop.eup %211 }
 0x121   :  { %v157_v62 = vmul.f32 %v212_v58, %v147_v59 }
 0x124   :  { %v214_v61 = vpop.eup %213 }
 0x125   :  { %v158_v63 = vmul.f32 %v214_v61, %v154_v60 }
 0x127   :  { %v162_v0 = vsel %vm161_vm2, %v158_v63, %v157_v62 }
 0x128   :  { %165 = vst.msk [vmem:[#allocation7] sm:$0x3] %vm164_vm3, %v162_v0 }
 0x129   :  { %266 = shalt.err (!%p263_p0)
}
 0x12a   :  { %175 = dma.vmem_to_hbm [thread:$0]  %s173_s1, 32, %s323_s2, [#allocation4]  }
 0x12b   :  { %279 = dma.done.wait [#allocation4], 32  }
 0x12c   :  { %280 = vsyncadd [#allocation4], 4294967264 }
 0x12d   :  { %179 = vsyncpa [#allocation3], 1 }
 0x12e   :  { %180 = vsyncpa [#allocation6], 1 }
 0x12f   :  { %181 = vsyncpa [#allocation4], 1 }

// kernel: tpu_custom_call.1
= control target key start
LH: loop header
LB: loop body
LE: loop exit
PB: predicated region body
PF: predicated region fallthrough
CT: control target
= control target key end

     0   :  { %7 = vsyncpa [#allocation3], 0  ;;  %s321_s0 = inlined_call_operand.hbm [shape: f32[2,8,32], index: 0, kind: input, shape index: {}]   ;;  %s322_s1 = inlined_call_operand.hbm [shape: bf16[32,32], index: 1, kind: input, shape index: {}]   ;;  %s323_s2 = inlined_call_operand.hbm [shape: f32[2,32], index: 2, kind: output, shape index: {}]  }
   0x1   :  { %8 = vsyncpa [#allocation6], 0 }
   0x2   :  { %9 = vsyncpa [#allocation4], 0  ;;  %s281_s9 = smov [#allocation2]  }
   0x3   :  { %s15_s10 = sshll.u32 %s281_s9, 4  ;;  %s16_s10 = int_to_ptr.vmem [resolvable:$true] %s15_s10 }
   0x4   :  { %s223_s11 = scalar_lea.vmem %s16_s10, 256  ;;  %p228_p1 = scmp.lt.s32.totalorder %s16_s10, %s16_s10 }
   0x5   :  { %p224_p0 = scmp.ne.s32.totalorder %s16_s10, %s223_s11  ;;  %p229_p2 = scmp.lt.s32.totalorder %s223_s11, %s223_s11 }
   0x7   :  { %p230_p3 = por %p229_p2, %p228_p1 }
   0x9   :  { %p231_p4 = pnand %p230_p3, %p224_p0 }
   0xb   :  { %234 = shalt.err (!%p231_p4)
}
   0xc   :  { %s282_s12 = smov 128   ;;  %s283_s13 = smov 8  }
   0xd   :  { %21 = dma.hbm_to_vmem [thread:$0]  %s321_s0, 256, %s16_s10, [#allocation3], %s282_s12, %s282_s12, %s283_s13  }
   0xe   :  { %s284_s16 = smov [#allocation5]  }
   0xf   :  { %s27_s17 = sshll.u32 %s284_s16, 4  ;;  %s28_s17 = int_to_ptr.vmem [resolvable:$true] %s27_s17 }
  0x10   :  { %s243_s18 = scalar_lea.vmem %s28_s17, 256  ;;  %p248_p6 = scmp.lt.s32.totalorder %s28_s17, %s28_s17 }
  0x11   :  { %p244_p5 = scmp.ne.s32.totalorder %s28_s17, %s243_s18  ;;  %p249_p7 = scmp.lt.s32.totalorder %s243_s18, %s243_s18 }
  0x13   :  { %p250_p8 = por %p249_p7, %p248_p6 }
  0x15   :  { %p251_p9 = pnand %p250_p8, %p244_p5 }
  0x17   :  { %254 = shalt.err (!%p251_p9)
}
  0x18   :  { %s285_s19 = smov 64   ;;  %s286_s20 = smov 4  }
  0x19   :  { %33 = dma.hbm_to_vmem [thread:$0]  %s322_s1, 256, %s28_s17, [#allocation6], %s285_s19, %s285_s19, %s286_s20  }
  0x1a   :  { %275 = dma.done.wait [#allocation3], 256  }
  0x1b   :  { %276 = vsyncadd [#allocation3], 4294967040 }
  0x1c   :  { %277 = dma.done.wait [#allocation6], 256  }
  0x1d   :  { %278 = vsyncadd [#allocation6], 4294967040  ;;  %v287_v0 = vmov 0.0   ;;  %vm288_vm0 = vmmov 0   ;;  %v205_v1 = vld [vmem:[#allocation5 + $0x8] sm:$0xff]   ;;  %v206_v2 = vld [vmem:[#allocation5] sm:$0xff]  }
  0x1e   :  { %188 = vmatprep.subr.bf16.mxu0 %v287_v0  ;;  %192 = vmatprep.mubr.msk.bf16.mxu0 %vm288_vm0, %v287_v0  ;;  %v41_v3 = vld [vmem:[#allocation2] sm:$0xff]  ;;  %v42_v4 = vld [vmem:[#allocation2 + $0x8] sm:$0xff]  ;;  %vm60_vm1 = vcmask 261120   ;;  %s289_s0 = smov [#allocation7]   ;;  %vm161_vm2 = vcmask 1041409   ;;  %vm164_vm3 = vcmask 254976  }
  0x1f   :  { %189 = vmatpush3.bf16.msra.mxu0 %v205_v1  ;;  %v43_v5 = vpack.c.bf16 %v42_v4, %v41_v3  ;;  %s172_s1 = sshll.u32 %s289_s0, 4  ;;  %s173_s1 = int_to_ptr.vmem [resolvable:$true] %s172_s1 }
  0x20   :  { %190 = vmatprep.subr.bf16.mxu0 %v287_v0  ;;  %s255_s23 = scalar_lea.vmem %s173_s1, 32  ;;  %p260_p11 = scmp.lt.s32.totalorder %s173_s1, %s173_s1 }
  0x21   :  { %p256_p10 = scmp.ne.s32.totalorder %s173_s1, %s255_s23  ;;  %p261_p12 = scmp.lt.s32.totalorder %s255_s23, %s255_s23 }
  0x23   :  { %191 = vmatpush3.bf16.msra.mxu0 %v206_v2  ;;  %p262_p13 = por %p261_p12, %p260_p11 }
  0x25   :  { %p263_p0 = pnand %p262_p13, %p256_p10 }
  0x26   :  { %193 = vmatmul.mubr.msk.bf16.vlgmr.msra.gmra.mxu0 %vm60_vm1, %v43_v5 }
  0xe6   :  { %v98_v6 = vpop.f32.mrf.mxu0 }
  0xe7   :  { %v105_v7 = vsel %vm60_vm1, %v98_v6, -inf }
  0xe8   :  { %v106_v8 = vrot.slane %v105_v7, 4  ;;  %v194_v9 = vpop.f32.mrf.mxu0 }
  0xea   :  { %v107_v10 = vmax.f32 %v105_v7, %v106_v8  ;;  %v101_v11 = vpop.f32.mrf.mxu0 }
  0xeb   :  { %v112_v12 = vsel %vm60_vm1, %v101_v11, -inf }
  0xec   :  { %v108_v13 = vrot.slane %v107_v10, 2  ;;  %v113_v14 = vrot.slane %v112_v12, 4  ;;  %v195_v15 = vpop.f32.mrf.mxu0 }
  0xee   :  { %v109_v16 = vmax.f32 %v107_v10, %v108_v13  ;;  %v114_v17 = vmax.f32 %v112_v12, %v113_v14 }
  0xf0   :  { %v110_v18 = vrot.slane %v109_v16, 1  ;;  %v115_v19 = vrot.slane %v114_v17, 2 }
  0xf2   :  { %v111_v20 = vmax.f32 %v109_v16, %v110_v18  ;;  %v116_v21 = vmax.f32 %v114_v17, %v115_v19 }
  0xf4   :  { %v119_v22 = vsub.f32 %v98_v6, %v111_v20  ;;  %v117_v23 = vrot.slane %v116_v21, 1 }
  0xf6   :  { %v121_v24 = vmul.f32 1.442695, %v119_v22  ;;  %v118_v25 = vmax.f32 %v116_v21, %v117_v23 }
  0xf8   :  { %207 = vpow2.f32 %v121_v24  ;;  %v120_v26 = vsub.f32 %v101_v11, %v118_v25 }
  0xfa   :  { %v123_v27 = vmul.f32 1.442695, %v120_v26 }
  0xfc   :  { %209 = vpow2.f32 %v123_v27 }
 0x105   :  { %v208_v28 = vpop.eup %207 }
 0x106   :  { %v125_v29 = vsel %vm60_vm1, %v208_v28, 0.0  ;;  %v139_v31 = vmul.f32 %v208_v28, %v41_v3 }
 0x107   :  { %v126_v30 = vrot.slane %v125_v29, 4 }
 0x108   :  { %v141_v38 = vsel %vm60_vm1, %v139_v31, 0.0 }
 0x109   :  { %v210_v32 = vpop.eup %209  ;;  %v127_v33 = vadd.f32 %v126_v30, %v125_v29  ;;  %v142_v44 = vrot.slane %v141_v38, 4 }
 0x10a   :  { %v132_v34 = vsel %vm60_vm1, %v210_v32, 0.0  ;;  %v140_v35 = vmul.f32 %v210_v32, %v42_v4 }
 0x10b   :  { %v128_v36 = vrot.slane %v127_v33, 2  ;;  %v133_v37 = vrot.slane %v132_v34, 4  ;;  %v143_v49 = vadd.f32 %v142_v44, %v141_v38 }
 0x10c   :  { %v148_v39 = vsel %vm60_vm1, %v140_v35, 0.0 }
 0x10d   :  { %v129_v40 = vadd.f32 %v128_v36, %v127_v33  ;;  %v134_v41 = vadd.f32 %v133_v37, %v132_v34  ;;  %v149_v45 = vrot.slane %v148_v39, 4  ;;  %v144_v52 = vrot.slane %v143_v49, 2 }
 0x10f   :  { %v130_v42 = vrot.slane %v129_v40, 1  ;;  %v135_v43 = vrot.slane %v134_v41, 2  ;;  %v150_v50 = vadd.f32 %v149_v45, %v148_v39  ;;  %v145_v54 = vadd.f32 %v144_v52, %v143_v49 }
 0x111   :  { %v131_v46 = vadd.f32 %v130_v42, %v129_v40  ;;  %v136_v47 = vadd.f32 %v135_v43, %v134_v41  ;;  %v151_v53 = vrot.slane %v150_v50, 2  ;;  %v146_v56 = vrot.slane %v145_v54, 1 }
 0x113   :  { %v137_v48 = vrot.slane %v136_v47, 1  ;;  %211 = vrcp.f32 %v131_v46  ;;  %v152_v55 = vadd.f32 %v151_v53, %v150_v50  ;;  %v147_v59 = vadd.f32 %v146_v56, %v145_v54 }
 0x115   :  { %v138_v51 = vadd.f32 %v137_v48, %v136_v47  ;;  %v153_v57 = vrot.slane %v152_v55, 1 }
 0x117   :  { %213 = vrcp.f32 %v138_v51  ;;  %v154_v60 = vadd.f32 %v153_v57, %v152_v55 }
 0x120   :  { %v212_v58 = vpop.eup %211 }
 0x121   :  { %v157_v62 = vmul.f32 %v212_v58, %v147_v59 }
 0x124   :  { %v214_v61 = vpop.eup %213 }
 0x125   :  { %v158_v63 = vmul.f32 %v214_v61, %v154_v60 }
 0x127   :  { %v162_v0 = vsel %vm161_vm2, %v158_v63, %v157_v62 }
 0x128   :  { %165 = vst.msk [vmem:[#allocation7] sm:$0x3] %vm164_vm3, %v162_v0 }
 0x129   :  { %266 = shalt.err (!%p263_p0)
}
 0x12a   :  { %175 = dma.vmem_to_hbm [thread:$0]  %s173_s1, 32, %s323_s2, [#allocation4]  }
 0x12b   :  { %279 = dma.done.wait [#allocation4], 32  }
 0x12c   :  { %280 = vsyncadd [#allocation4], 4294967264 }
 0x12d   :  { %179 = vsyncpa [#allocation3], 1 }
 0x12e   :  { %180 = vsyncpa [#allocation6], 1 }
 0x12f   :  { %181 = vsyncpa [#allocation4], 1 }

</bundles_post_ra>
